<compile_context>
chip_gen: v7x
topology: tpu7x:2x2x1
jax: 0.10.0
libtpu: 0.0.40
codegen_flags: <defaults>
</compile_context>

<pallas_src>
import jax
import jax.numpy as jnp
from jax.experimental import pallas as pl
from jax.experimental.pallas import tpu as pltpu

C_IN = 32     # c_in1
C_H = 64      # c_out1
C_OUT = 32    # c_out2 (== c_in1, required by the residual add in the module)
EPS = 1e-5
MAX_TILE_E = 512


def _round_up(x, m):
    return (x + m - 1) // m * m


def _choose_tile(e):
    """Edge-tile size: big (amortize ~0.35us/grid-step overhead) but keep >=2
    grid steps when possible so both TensorCores (v7x) get work."""
    e8 = _round_up(max(e, 1), 8)
    tile = _round_up(e8 // 2, 8) if e8 >= 16 else e8
    return min(MAX_TILE_E, tile)


def _edge_kernel(xcat_ref, w1_ref, b1_ref, w2_ref, bout_ref, out_ref):
    # Fused node+edge FCNN: x_cat (T,64) @ blockdiag(W1a,W1b) (64,128),
    # +b1, ReLU, @ vstack(W2a,W2b) (128,32), + (b2a + b2b + FCNN3(global)).
    h = jnp.dot(xcat_ref[...], w1_ref[...], preferred_element_type=jnp.float32)
    h = jnp.maximum(h + b1_ref[...], 0.0)
    x = jnp.dot(h, w2_ref[...], preferred_element_type=jnp.float32) + bout_ref[...]

    # InstanceNorm1d over the feature vector (no affine, biased var, eps=1e-5).
    mean = jnp.mean(x, axis=-1, keepdims=True)
    var = jnp.mean(x * x, axis=-1, keepdims=True) - mean * mean
    xn = (x - mean) * jax.lax.rsqrt(var + EPS)

    # TODO(synk): nn.Dropout(p=0.1) treated as identity (inference); no RNG mask.
    out_ref[...] = jnp.maximum(xn, 0.0)


def _intermediate_features(node_sum, edge_feat, global_feat, params):
    """Pallas kernel over all edges; returns (E, C_OUT) per-edge updates."""
    (w1a, b1a, w2a, b2a), (w1b, b1b, w2b, b2b), (w1c, b1c, w2c, b2c) = params

    # Grid-invariant global branch -> computed once, folded into output bias.
    glob = jnp.maximum(global_feat @ w1c + b1c, 0.0) @ w2c + b2c          # (1, C_OUT)
    bias_out = (b2a + b2b + glob).astype(jnp.float32)                     # (1, C_OUT)

    # Pack node/edge weights: block-diagonal W1, stacked W2, concatenated b1.
    zeros = jnp.zeros((C_IN, C_H), jnp.float32)
    w1_bd = jnp.concatenate(
        [jnp.concatenate([w1a, zeros], axis=1),
         jnp.concatenate([zeros, w1b], axis=1)], axis=0)                  # (64, 128)
    b1_cat = jnp.concatenate([b1a, b1b], axis=1)                          # (1, 128)
    w2_cat = jnp.concatenate([w2a, w2b], axis=0)                          # (128, 32)

    E = node_sum.shape[0]
    tile = _choose_tile(E)
    e_pad = _round_up(E, tile)

    x_cat = jnp.concatenate([node_sum, edge_feat], axis=-1)               # (E, 64)
    if e_pad != E:
        x_cat = jnp.pad(x_cat, ((0, e_pad - E), (0, 0)))

    def full(shape):
        return pl.BlockSpec(shape, lambda i: (0, 0))

    out = pl.pallas_call(
        _edge_kernel,
        out_shape=jax.ShapeDtypeStruct((e_pad, C_OUT), jnp.float32),
        grid=(e_pad // tile,),
        in_specs=[
            pl.BlockSpec((tile, 2 * C_IN), lambda i: (i, 0)),
            full((2 * C_IN, 2 * C_H)),
            full((1, 2 * C_H)),
            full((2 * C_H, C_OUT)),
            full((1, C_OUT)),
        ],
        out_specs=pl.BlockSpec((tile, C_OUT), lambda i: (i, 0)),
        compiler_params=pltpu.CompilerParams(dimension_semantics=("parallel",)),
    )(x_cat, w1_bd, b1_cat, w2_cat, bias_out)
    return out[:E]


@jax.jit
def edge_features_forward(node_features, edge_index, edge_features, global_features, params):
    """Exact semantics of EdgeFeatures.forward (inference)."""
    src = edge_index[0, 0]                                     # (E,)
    dst = edge_index[0, 1]                                     # (E,)
    node_sum = node_features[0, src] + node_features[0, dst]   # (E, C_IN)
    ef = edge_features[0]                                      # (E, C_IN)
    gf = global_features[0]                                    # (1, C_IN)

    inter = _intermediate_features(node_sum, ef, gf, params)   # (E, C_OUT)

    # Literal module semantics: the loop runs for i in range(edge_index.shape[1])
    # and clones edge_features INSIDE the loop, so only the update of edge
    # (edge_index.shape[1] - 1) survives in the returned tensor.
    last = edge_index.shape[1] - 1
    return edge_features.at[0, last].set(edge_features[0, last] + inter[last])


def _init_fcnn(key, c_in, c_h, c_out):
    """Deterministic nn.Linear-style init (uniform +/- 1/sqrt(fan_in))."""
    k1, k2, k3, k4 = jax.random.split(key, 4)
    lim1 = 1.0 / (c_in ** 0.5)
    lim2 = 1.0 / (c_h ** 0.5)
    w1 = jax.random.uniform(k1, (c_in, c_h), jnp.float32, -lim1, lim1)
    b1 = jax.random.uniform(k2, (1, c_h), jnp.float32, -lim1, lim1)
    w2 = jax.random.uniform(k3, (c_h, c_out), jnp.float32, -lim2, lim2)
    b2 = jax.random.uniform(k4, (1, c_out), jnp.float32, -lim2, lim2)
    return (w1, b1, w2, b2)


def _fcnn_ref(x, p):
    w1, b1, w2, b2 = p
    return jnp.maximum(x @ w1 + b1[0], 0.0) @ w2 + b2[0]


def _reference(node_features, edge_index, edge_features, global_features, params):
    """Pure-JAX literal transcription of the PyTorch loop (inference)."""
    out = edge_features
    for i in range(edge_index.shape[1]):          # literal: dim-1 of edge_index
        fi = edge_index[0, 0, i]
        si = edge_index[0, 1, i]
        ns = node_features[0, fi] + node_features[0, si]
        x = (_fcnn_ref(ns, params[0])
             + _fcnn_ref(edge_features[0, i], params[1])
             + _fcnn_ref(global_features[0, 0], params[2]))
        m = x.mean()
        v = ((x - m) ** 2).mean()
        xr = jnp.maximum((x - m) / jnp.sqrt(v + EPS), 0.0)
        # clone-inside-loop: start from the ORIGINAL edge_features every iter.
        out = edge_features.at[0, i].set(edge_features[0, i] + xr)
    return out


def _reference_intermediate(node_sum, ef, gf, params):
    """Vectorized reference for the per-edge updates (checks every edge)."""
    x = (_fcnn_ref(node_sum, params[0]) + _fcnn_ref(ef, params[1])
         + _fcnn_ref(gf, params[2]))
    m = x.mean(-1, keepdims=True)
    v = ((x - m) ** 2).mean(-1, keepdims=True)
    return jnp.maximum((x - m) / jnp.sqrt(v + EPS), 0.0)


if __name__ == "__main__":
    key = jax.random.PRNGKey(0)
    kp1, kp2, kp3, kn, ke, kg, ki = jax.random.split(key, 7)

    N, E = 8, 16
    node_features = jax.random.normal(kn, (1, N, C_IN), jnp.float32)
    edge_features = jax.random.normal(ke, (1, E, C_IN), jnp.float32)
    global_features = jax.random.normal(kg, (1, 1, C_IN), jnp.float32)
    edge_index = jax.random.randint(ki, (1, 2, E), 0, N, dtype=jnp.int32)

    params = (
        _init_fcnn(kp1, C_IN, C_H, C_OUT),  # FCNN_one   (node branch)
        _init_fcnn(kp2, C_IN, C_H, C_OUT),  # FCNN_two   (edge branch)
        _init_fcnn(kp3, C_IN, C_H, C_OUT),  # FCNN_three (global branch)
    )

    out = edge_features_forward(node_features, edge_index, edge_features,
                                global_features, params)
    out = jax.block_until_ready(out)

    # Check 1: full module output against a literal transcription of the loop.
    ref = _reference(node_features, edge_index, edge_features,
                     global_features, params)
    assert out.shape == edge_features.shape
    assert jnp.allclose(out, ref, rtol=1e-4, atol=1e-4)

    # Check 2: the kernel's per-edge updates against a vectorized reference
    # (exercises every edge, not just the one that survives the clone).
    src = edge_index[0, 0]
    dst = edge_index[0, 1]
    node_sum = node_features[0, src] + node_features[0, dst]
    inter = _intermediate_features(node_sum, edge_features[0],
                                   global_features[0], params)
    inter_ref = _reference_intermediate(node_sum, edge_features[0],
                                        global_features[0, 0], params)
    assert jnp.allclose(inter, inter_ref, rtol=1e-4, atol=1e-4)

    print("KERNEL_OK")
</pallas_src>

<mosaic_0001>
module attributes {stable_mosaic.version = 11 : i64} {
  func.func @_edge_kernel(%arg0: i32, %arg1: memref<8x64xf32, #tpu.memory_space<vmem>>, %arg2: memref<64x128xf32, #tpu.memory_space<vmem>>, %arg3: memref<1x128xf32, #tpu.memory_space<vmem>>, %arg4: memref<128x32xf32, #tpu.memory_space<vmem>>, %arg5: memref<1x32xf32, #tpu.memory_space<vmem>>, %arg6: memref<8x32xf32, #tpu.memory_space<vmem>>) attributes {dimension_semantics = [#tpu.dimension_semantics<parallel>], iteration_bounds = array<i64: 2>, scalar_prefetch = 0 : i64, scratch_operands = 0 : i64, tpu.core_type = #tpu.core_type<tc>, window_params = [{transform_indices = @transform_0, window_bounds = array<i64: 8, 64>}, {pipeline_mode = #tpu.pipeline_mode<synchronous>, transform_indices = @transform_1, window_bounds = array<i64: 64, 128>}, {pipeline_mode = #tpu.pipeline_mode<synchronous>, transform_indices = @transform_2, window_bounds = array<i64: 1, 128>}, {pipeline_mode = #tpu.pipeline_mode<synchronous>, transform_indices = @transform_3, window_bounds = array<i64: 128, 32>}, {pipeline_mode = #tpu.pipeline_mode<synchronous>, transform_indices = @transform_4, window_bounds = array<i64: 1, 32>}, {transform_indices = @transform_5, window_bounds = array<i64: 8, 32>}]} {
    %c0 = arith.constant 0 : index
    %c0_0 = arith.constant 0 : index
    %0 = vector.load %arg1[%c0, %c0_0] : memref<8x64xf32, #tpu.memory_space<vmem>>, vector<8x64xf32>
    %c0_1 = arith.constant 0 : index
    %c0_2 = arith.constant 0 : index
    %1 = vector.load %arg2[%c0_1, %c0_2] : memref<64x128xf32, #tpu.memory_space<vmem>>, vector<64x128xf32>
    %cst = arith.constant dense<0.000000e+00> : vector<8x128xf32>
    %2 = tpu.matmul %0, %1, %cst {dimension_numbers = #tpu.dot_dimension_numbers<[1], [0], [0], [1], [0, 0, 1, 1], [], []>} : vector<8x64xf32>, vector<64x128xf32>, vector<8x128xf32> -> vector<8x128xf32>
    %c0_3 = arith.constant 0 : index
    %c0_4 = arith.constant 0 : index
    %3 = vector.load %arg3[%c0_3, %c0_4] : memref<1x128xf32, #tpu.memory_space<vmem>>, vector<1x128xf32>
    %4 = vector.broadcast %3 : vector<1x128xf32> to vector<8x128xf32>
    %5 = arith.addf %2, %4 : vector<8x128xf32>
    %cst_5 = arith.constant 0.000000e+00 : f32
    %6 = vector.broadcast %cst_5 : f32 to vector<8x128xf32>
    %7 = arith.maximumf %5, %6 : vector<8x128xf32>
    %c0_6 = arith.constant 0 : index
    %c0_7 = arith.constant 0 : index
    %8 = vector.load %arg4[%c0_6, %c0_7] : memref<128x32xf32, #tpu.memory_space<vmem>>, vector<128x32xf32>
    %cst_8 = arith.constant dense<0.000000e+00> : vector<8x32xf32>
    %9 = tpu.matmul %7, %8, %cst_8 {dimension_numbers = #tpu.dot_dimension_numbers<[1], [0], [0], [1], [0, 0, 1, 1], [], []>} : vector<8x128xf32>, vector<128x32xf32>, vector<8x32xf32> -> vector<8x32xf32>
    %c0_9 = arith.constant 0 : index
    %c0_10 = arith.constant 0 : index
    %10 = vector.load %arg5[%c0_9, %c0_10] : memref<1x32xf32, #tpu.memory_space<vmem>>, vector<1x32xf32>
    %11 = vector.broadcast %10 : vector<1x32xf32> to vector<8x32xf32>
    %12 = arith.addf %9, %11 : vector<8x32xf32>
    %cst_11 = arith.constant dense<0.000000e+00> : vector<8xf32>
    %13 = vector.multi_reduction <add>, %12, %cst_11 [1] : vector<8x32xf32> to vector<8xf32>
    %14 = vector.shape_cast %13 : vector<8xf32> to vector<8x1xf32>
    %cst_12 = arith.constant 3.200000e+01 : f32
    %15 = vector.broadcast %cst_12 : f32 to vector<8x1xf32>
    %16 = arith.divf %14, %15 : vector<8x1xf32>
    %17 = arith.mulf %12, %12 : vector<8x32xf32>
    %cst_13 = arith.constant dense<0.000000e+00> : vector<8xf32>
    %18 = vector.multi_reduction <add>, %17, %cst_13 [1] : vector<8x32xf32> to vector<8xf32>
    %19 = vector.shape_cast %18 : vector<8xf32> to vector<8x1xf32>
    %cst_14 = arith.constant 3.200000e+01 : f32
    %20 = vector.broadcast %cst_14 : f32 to vector<8x1xf32>
    %21 = arith.divf %19, %20 : vector<8x1xf32>
    %22 = arith.mulf %16, %16 : vector<8x1xf32>
    %23 = arith.subf %21, %22 : vector<8x1xf32>
    %24 = vector.broadcast %16 : vector<8x1xf32> to vector<8x32xf32>
    %25 = arith.subf %12, %24 : vector<8x32xf32>
    %cst_15 = arith.constant 9.99999974E-6 : f32
    %26 = vector.broadcast %cst_15 : f32 to vector<8x1xf32>
    %27 = arith.addf %23, %26 : vector<8x1xf32>
    %28 = math.rsqrt %27 : vector<8x1xf32>
    %29 = vector.broadcast %28 : vector<8x1xf32> to vector<8x32xf32>
    %30 = arith.mulf %25, %29 : vector<8x32xf32>
    %cst_16 = arith.constant 0.000000e+00 : f32
    %31 = vector.broadcast %cst_16 : f32 to vector<8x32xf32>
    %32 = arith.maximumf %30, %31 : vector<8x32xf32>
    %c0_17 = arith.constant 0 : index
    %c0_18 = arith.constant 0 : index
    %33 = vector.load %arg6[%c0_17, %c0_18] : memref<8x32xf32, #tpu.memory_space<vmem>>, vector<8x32xf32>
    tpu.vector_store %arg6[%c0_17, %c0_18], %32 {strides = array<i32>} : memref<8x32xf32, #tpu.memory_space<vmem>>, vector<8x32xf32>,
    return
  }
  func.func @transform_0(%arg0: i32) -> (i32, i32) {
    %c0_i32 = arith.constant 0 : i32
    %c0_i32_0 = arith.constant 0 : i32
    return %arg0, %c0_i32 : i32, i32
  }
  func.func @transform_1(%arg0: i32) -> (i32, i32) {
    %c0_i32 = arith.constant 0 : i32
    %c0_i32_0 = arith.constant 0 : i32
    %c0_i32_1 = arith.constant 0 : i32
    return %c0_i32, %c0_i32_0 : i32, i32
  }
  func.func @transform_2(%arg0: i32) -> (i32, i32) {
    %c0_i32 = arith.constant 0 : i32
    %c0_i32_0 = arith.constant 0 : i32
    %c0_i32_1 = arith.constant 0 : i32
    return %c0_i32, %c0_i32_0 : i32, i32
  }
  func.func @transform_3(%arg0: i32) -> (i32, i32) {
    %c0_i32 = arith.constant 0 : i32
    %c0_i32_0 = arith.constant 0 : i32
    %c0_i32_1 = arith.constant 0 : i32
    return %c0_i32, %c0_i32_0 : i32, i32
  }
  func.func @transform_4(%arg0: i32) -> (i32, i32) {
    %c0_i32 = arith.constant 0 : i32
    %c0_i32_0 = arith.constant 0 : i32
    %c0_i32_1 = arith.constant 0 : i32
    return %c0_i32, %c0_i32_0 : i32, i32
  }
  func.func @transform_5(%arg0: i32) -> (i32, i32) {
    %c0_i32 = arith.constant 0 : i32
    %c0_i32_0 = arith.constant 0 : i32
    return %arg0, %c0_i32 : i32, i32
  }
}

</mosaic_0001>

<bundles_post_ra>
// kernel: edge_features_forward.1
= control target key start
LH: loop header
LB: loop body
LE: loop exit
PB: predicated region body
PF: predicated region fallthrough
CT: control target
= control target key end

     0   :  { %s658_s18 = smov 0   ;;  %s775_s0 = inlined_call_operand.vmem [shape: f32[16,64], index: 0, kind: input, shape index: {}]   ;;  %s776_s1 = inlined_call_operand.vmem [shape: f32[64,128], index: 1, kind: input, shape index: {}]   ;;  %s777_s2 = inlined_call_operand.vmem [shape: f32[1,128], index: 2, kind: input, shape index: {}]   ;;  %s778_s3 = inlined_call_operand.vmem [shape: f32[128,32], index: 3, kind: input, shape index: {}]   ;;  %s779_s4 = inlined_call_operand.vmem [shape: f32[1,32], index: 4, kind: input, shape index: {}]   ;;  %s780_s5 = inlined_call_operand.vmem [shape: f32[16,32], index: 5, kind: output, shape index: {}]  }
   0x1 LB: > { %s476_s19 = sadd.s32 4294967295, %s623_s18   ;;  %p480_p0 = scmp.ge.s32.totalorder %s623_s18, 1  ;;  %s623_s18 = sphi %s658_s18, %s15_s18  }
   0x2   : > { %p186_p1 = scmp.lt.s32.totalorder %s623_s18, 3 }
   0x4   : > { %p187_p2 = pnand %p480_p0, %p186_p1 }
   0x5   : > { %v221_v0 = vld [vmem:[%s776_s1] sm:$0xff] (!%p187_p2)  ;;  %v222_v1 = vld [vmem:[%s776_s1 + $0x8] sm:$0xff] (!%p187_p2)  ;;  %v223_v2 = vld [vmem:[%s776_s1 + $0x10] sm:$0xff] (!%p187_p2)  ;;  %v625_v3 = vmov (!%p187_p2), 0.0|0.0   ;;  %vm626_vm0 = vmmov (!%p187_p2), 0   ;;  %v627_v6 = vmov (!%p187_p2), 0.0  }
   0x6   : > { %190 = sbr.rel (%p187_p2) target bundleno = 622 (0x26e), region = 40  ;;  %568 = vmatprep.subr.bf16.mxu0 (!%p187_p2), %v625_v3  ;;  %v569_v4 = vpack.c.bf16 (!%p187_p2), %v222_v1, %v221_v0  ;;  %v224_v5 = vld [vmem:[%s776_s1 + $0x18] sm:$0xff] (!%p187_p2)  ;;  %530 = vmatprep.mubr.msk.f32.mxu0 (!%p187_p2), %vm626_vm0, %v627_v6  ;;  %p212_p3 = scmp.lt.s32.totalorder (!%p187_p2), %s476_s19, 1  ;;  %v311_v7 = vld [vmem:[%s778_s3] sm:$0xff] (!%p187_p2)  ;;  %v312_v9 = vld [vmem:[%s778_s3 + $0x8] sm:$0xff] (!%p187_p2)  ;;  %vm236_vm1 = vcmask (!%p187_p2), 523264  }
   0x7   : > { %580 = vmatprep.subr.bf16.mxu1 (!%p187_p2), %v625_v3  ;;  %565 = vmatprep.mubr.msk.f32.mxu1 (!%p187_p2), %vm626_vm0, %v627_v6  ;;  %v572_v8 = vpack.c.bf16 (!%p187_p2), %v224_v5, %v223_v2  ;;  %v313_v10 = vld [vmem:[%s778_s3 + $0x10] sm:$0xff] (!%p187_p2)  ;;  %v314_v11 = vld [vmem:[%s778_s3 + $0x18] sm:$0xff] (!%p187_p2)  ;;  %v225_v12 = vld [vmem:[%s776_s1 + $0x20] sm:$0xff] (!%p187_p2)  ;;  %v581_v14 = vpack.c.bf16 (!%p187_p2), %v312_v9, %v311_v7  ;;  %vm404_vm2 = vcmask (!%p187_p2), 261120  }
   0x8   : > { %570 = vmatpush3.bf16.msra.mxu0 (!%p187_p2), %v569_v4  ;;  %v226_v13 = vld [vmem:[%s776_s1 + $0x28] sm:$0xff] (!%p187_p2)  ;;  %v584_v15 = vpack.c.bf16 (!%p187_p2), %v314_v11, %v313_v10  ;;  %v315_v17 = vld [vmem:[%s778_s3 + $0x20] sm:$0xff] (!%p187_p2)  ;;  %v227_v19 = vld [vmem:[%s776_s1 + $0x30] sm:$0xff] (!%p187_p2) }
   0x9   : > { %571 = vmatprep.subr.bf16.mxu0 (!%p187_p2), %v625_v3  ;;  %582 = vmatpush3.bf16.msra.mxu1 (!%p187_p2), %v581_v14  ;;  %v575_v16 = vpack.c.bf16 (!%p187_p2), %v226_v13, %v225_v12  ;;  %v316_v18 = vld [vmem:[%s778_s3 + $0x28] sm:$0xff] (!%p187_p2)  ;;  %v228_v20 = vld [vmem:[%s776_s1 + $0x38] sm:$0xff] (!%p187_p2)  ;;  %v317_v23 = vld [vmem:[%s778_s3 + $0x30] sm:$0xff] (!%p187_p2) }
   0xa   : > { %583 = vmatprep.subr.bf16.mxu1 (!%p187_p2), %v625_v3  ;;  %v587_v21 = vpack.c.bf16 (!%p187_p2), %v316_v18, %v315_v17  ;;  %v578_v22 = vpack.c.bf16 (!%p187_p2), %v228_v20, %v227_v19  ;;  %v318_v24 = vld [vmem:[%s778_s3 + $0x38] sm:$0xff] (!%p187_p2)  ;;  %v319_v27 = vld [vmem:[%s778_s3 + $0x40] sm:$0xff] (!%p187_p2)  ;;  %v320_v28 = vld [vmem:[%s778_s3 + $0x48] sm:$0xff] (!%p187_p2) }
   0xb   : > { %v590_v25 = vpack.c.bf16 (!%p187_p2), %v318_v24, %v317_v23  ;;  %v593_v29 = vpack.c.bf16 (!%p187_p2), %v320_v28, %v319_v27  ;;  %v321_v30 = vld [vmem:[%s778_s3 + $0x50] sm:$0xff] (!%p187_p2)  ;;  %v322_v31 = vld [vmem:[%s778_s3 + $0x58] sm:$0xff] (!%p187_p2)  ;;  %v323_v33 = vld [vmem:[%s778_s3 + $0x60] sm:$0xff] (!%p187_p2) }
   0xc   : > { %573 = vmatpush3.bf16.msra.mxu0 (!%p187_p2), %v572_v8  ;;  %v596_v32 = vpack.c.bf16 (!%p187_p2), %v322_v31, %v321_v30  ;;  %v324_v34 = vld [vmem:[%s778_s3 + $0x68] sm:$0xff] (!%p187_p2)  ;;  %v325_v36 = vld [vmem:[%s778_s3 + $0x70] sm:$0xff] (!%p187_p2)  ;;  %v326_v37 = vld [vmem:[%s778_s3 + $0x78] sm:$0xff] (!%p187_p2) }
   0xd   : > { %s782_s19 = smov (!%p212_p3, %s476_s19), 1  ;;  %574 = vmatprep.subr.bf16.mxu0 %v625_v3  ;;  %585 = vmatpush3.bf16.msra.mxu1 %v584_v15  ;;  %v599_v35 = vpack.c.bf16 %v324_v34, %v323_v33  ;;  %v602_v38 = vpack.c.bf16 %v326_v37, %v325_v36  ;;  %v483_v39 = vld [vmem:[%s777_s2] ss:$0 sm:$0xff] }
   0xe   : > { %s481_s25 = sshll.u32 %s782_s19, 3  ;;  %586 = vmatprep.subr.bf16.mxu1 %v625_v3  ;;  %v485_v44 = vld [vmem:[%s779_s4] ss:$0 sm:$0xff] }
   0xf   : > { %s215_s7 = scalar_lea.vmem %s775_s0, %s481_s25  ;;  %s219_s8 = scalar_lea.vmem %s780_s5, %s481_s25 }
  0x10   : > { %576 = vmatpush3.bf16.msra.mxu0 %v575_v16  ;;  %v220_v26 = vld [vmem:[%s215_s7] sm:$0xff] }
  0x11   : > { %577 = vmatprep.subr.bf16.mxu0 %v625_v3  ;;  %588 = vmatpush3.bf16.msra.mxu1 %v587_v21 }
  0x12   : > { %589 = vmatprep.subr.bf16.mxu1 %v625_v3 }
  0x14   : > { %579 = vmatpush3.bf16.msra.mxu0 %v578_v22 }
  0x15   : > { %591 = vmatpush3.bf16.msra.mxu1 %v590_v25 }
  0x16   : > { %592 = vmatprep.subr.bf16.mxu1 %v625_v3 }
  0x17   : > { %531 = vmatmul.mubr.msk.f32.vlgmr.msra.gmra.mrb[0].mxu0 %vm236_vm1, %v220_v26 }
  0x19   : > { %594 = vmatpush3.bf16.msra.mxu1 %v593_v29 }
  0x1a   : > { %595 = vmatprep.subr.bf16.mxu1 %v625_v3 }
  0x1d   : > { %597 = vmatpush3.bf16.msra.mxu1 %v596_v32 }
  0x1e   : > { %598 = vmatprep.subr.bf16.mxu1 %v625_v3 }
  0x21   : > { %600 = vmatpush3.bf16.msra.mxu1 %v599_v35 }
  0x22   : > { %601 = vmatprep.subr.bf16.mxu1 %v625_v3 }
  0x25   : > { %603 = vmatpush3.bf16.msra.mxu1 %v602_v38 }
  0xea   : > { %v306_v40 = vpop.f32.mrb[0].mxu0 }
  0xeb   : > { %v307_v41 = vadd.f32 %v483_v39, %v306_v40  ;;  %v532_v42 = vpop.f32.mrb[1].mxu0 }
  0xed   : > { %v310_v43 = vmax.f32 %v307_v41, 0.0 }
  0xef   : > { %566 = vmatmul.mubr.f32.vlgmr.msra.gmra.mrb[0].mxu1 %v310_v43 }
 0x1c2   : > { %v400_v45 = vpop.f32.mrb[0].mxu1 }
 0x1c3   : > { %v401_v46 = vadd.f32 %v485_v44, %v400_v45  ;;  %v567_v47 = vpop.f32.mrb[1].mxu1 }
 0x1c5   : > { %v405_v48 = vsel %vm404_vm2, %v401_v46, 0.0  ;;  %v410_v49 = vmul.f32 %v401_v46, %v401_v46 }
 0x1c6   : > { %406 = vadd.xlane.f32.xlu0 %v405_v48 }
 0x1c7   : > { %v411_v50 = vsel %vm404_vm2, %v410_v49, 0.0 }
 0x1ca   : > { %412 = vadd.xlane.f32.xlu0 %v411_v50 }
 0x253   : > { %v407_v51 = vpop.xlane.xlu0 %406 }
 0x254   : > { %v409_v52 = vmul.f32 0.03125, %v407_v51 }
 0x256   : > { %v415_v54 = vmul.f32 %v409_v52, %v409_v52  ;;  %v417_v58 = vsub.f32 %v401_v46, %v409_v52 }
 0x257   : > { %v413_v53 = vpop.xlane.xlu0 %412 }
 0x258   : > { %v414_v55 = vmul.f32 0.03125, %v413_v53 }
 0x25a   : > { %v416_v56 = vsub.f32 %v414_v55, %v415_v54 }
 0x25c   : > { %v418_v57 = vadd.f32 1e-05, %v416_v56 }
 0x25e   : > { %615 = vrsqrt.f32 %v418_v57 }
 0x268   : > { %v616_v59 = vpop.eup %615 }
 0x269   : > { %v420_v60 = vmul.f32 %v616_v59, %v417_v58 }
 0x26b   : > { %v421_v61 = vmax.f32 %v420_v60, 0.0 }
 0x26d   : > { %422 = vst.msk [vmem:[%s219_s8] sm:$0xff] %vm404_vm2, %v421_v61 }
 0x26e PF: > { %s15_s18 = sadd.s32 1, %s623_s18  }
 0x26f   : > { %p12_p4 = scmp.ge.s32.totalorder %s15_s18, 4  }
 0x271   :  { %14 = sbr.rel (!%p12_p4) target bundleno = 1 (0x1), region = 70 }

</bundles_post_ra>
